<compile_context>
chip_gen: v5e
topology: v5e:2x2
jax: 0.10.0
libtpu: 0.0.40
codegen_flags: <defaults>
</compile_context>

<pallas_src>
import jax
import jax.numpy as jnp
from jax.experimental import pallas as pl
from jax.experimental.pallas import tpu as pltpu

LANE = 128            # vreg lane width (fast axis)
SUBLANE = 8           # f32 sublane tile
MAX_TILE_ROWS = 1024  # (1024, 128) f32 tile = 512 KiB; with double-buffered
                      # in + out buffers that's ~2 MiB of VMEM -> far under the
                      # scoped VMEM limit on v5e/v6e/v7x.


def linear_kernel(x_ref, w_ref, b_ref, o_ref):
    # x_ref / o_ref: (TR, 128) lane-dense VMEM tiles.
    # w_ref / b_ref: (1, 1) SMEM scalars.
    w = w_ref[0, 0]
    b = b_ref[0, 0]
    # Pure VPU fused multiply-add; one unmasked vst per vreg.
    o_ref[...] = x_ref[...] * w + b


def _pick_row_tile(rows: int) -> int:
    """Row tile: multiple of the f32 sublane tile (8), capped for VMEM."""
    tr = ((rows + SUBLANE - 1) // SUBLANE) * SUBLANE
    return min(MAX_TILE_ROWS, max(SUBLANE, tr))


def linear_forward(x, weight, bias):
    """x: (B, 1) f32; weight: (1, 1) f32; bias: (1,) f32 -> (B, 1) f32."""
    B, in_f = x.shape
    out_f = weight.shape[0]
    assert in_f == 1 and out_f == 1, "LinearRegressionModel is nn.Linear(1, 1)"

    # ---- lane-dense repacking: (B, 1) -> (padded_rows, 128) ------------------
    rows = pl.cdiv(B, LANE)                          # rows of 128 lanes needed
    tr = _pick_row_tile(rows)
    padded_rows = ((rows + tr - 1) // tr) * tr       # grid divides evenly
    total_padded = padded_rows * LANE

    x_flat = x.astype(jnp.float32).reshape(-1)
    x_packed = jnp.pad(x_flat, (0, total_padded - B)).reshape(padded_rows, LANE)

    w_s = weight.astype(jnp.float32).reshape(1, 1)
    b_s = bias.astype(jnp.float32).reshape(1, 1)

    grid = (padded_rows // tr,)

    y_packed = pl.pallas_call(
        linear_kernel,
        out_shape=jax.ShapeDtypeStruct((padded_rows, LANE), jnp.float32),
        grid=grid,
        in_specs=[
            pl.BlockSpec((tr, LANE), lambda i: (i, 0)),            # x tile (VMEM)
            pl.BlockSpec(memory_space=pltpu.MemorySpace.SMEM),     # weight scalar
            pl.BlockSpec(memory_space=pltpu.MemorySpace.SMEM),     # bias scalar
        ],
        out_specs=pl.BlockSpec((tr, LANE), lambda i: (i, 0)),
        compiler_params=pltpu.CompilerParams(
            # Megacore sharding on multi-TC parts; harmless no-op on v5e/v6e.
            dimension_semantics=("parallel",),
        ),
    )(x_packed, w_s, b_s)

    # Drop padding and restore (B, 1).
    return y_packed.reshape(-1)[:B].reshape(B, out_f)


if __name__ == "__main__":
    key = jax.random.PRNGKey(0)
    kx, kw, kb = jax.random.split(key, 3)

    B = 8  # small batch (toy size; the kernel tiles cleanly for large B too)
    weight = jax.random.uniform(kw, (1, 1), jnp.float32, minval=-1.0, maxval=1.0)
    bias = jax.random.uniform(kb, (1,), jnp.float32, minval=-1.0, maxval=1.0)
    x = jax.random.normal(kx, (B, 1), jnp.float32)

    y = linear_forward(x, weight, bias)
    y = jax.block_until_ready(y)

    # Reference check in plain JAX.
    y_ref = x @ weight.T + bias
    assert y.shape == (B, 1)
    assert jnp.allclose(y, y_ref, atol=1e-5), "mismatch vs reference"
    print("KERNEL_OK")
</pallas_src>

<mosaic_0001>
module attributes {stable_mosaic.version = 11 : i64} {
  func.func @linear_kernel(%arg0: i32, %arg1: memref<8x128xf32, #tpu.memory_space<vmem>>, %arg2: memref<1x1xf32, #tpu.memory_space<smem>>, %arg3: memref<1x1xf32, #tpu.memory_space<smem>>, %arg4: memref<8x128xf32, #tpu.memory_space<vmem>>) attributes {dimension_semantics = [#tpu.dimension_semantics<parallel>], iteration_bounds = array<i64: 1>, scalar_prefetch = 0 : i64, scratch_operands = 0 : i64, tpu.core_type = #tpu.core_type<tc>, window_params = [{transform_indices = @transform_0, window_bounds = array<i64: 8, 128>}, {transform_indices = @transform_1, window_bounds = array<i64: 1, 1>}, {transform_indices = @transform_2, window_bounds = array<i64: 1, 1>}, {transform_indices = @transform_3, window_bounds = array<i64: 8, 128>}]} {
    %c0 = arith.constant 0 : index
    %c0_0 = arith.constant 0 : index
    %0 = memref.load %arg2[%c0, %c0_0] : memref<1x1xf32, #tpu.memory_space<smem>>
    %c0_1 = arith.constant 0 : index
    %c0_2 = arith.constant 0 : index
    %1 = memref.load %arg3[%c0_1, %c0_2] : memref<1x1xf32, #tpu.memory_space<smem>>
    %c0_3 = arith.constant 0 : index
    %c0_4 = arith.constant 0 : index
    %2 = vector.load %arg1[%c0_3, %c0_4] : memref<8x128xf32, #tpu.memory_space<vmem>>, vector<8x128xf32>
    %3 = vector.broadcast %0 : f32 to vector<8x128xf32>
    %4 = arith.mulf %2, %3 : vector<8x128xf32>
    %5 = vector.broadcast %1 : f32 to vector<8x128xf32>
    %6 = arith.addf %4, %5 : vector<8x128xf32>
    %c0_5 = arith.constant 0 : index
    %c0_6 = arith.constant 0 : index
    %7 = vector.load %arg4[%c0_5, %c0_6] : memref<8x128xf32, #tpu.memory_space<vmem>>, vector<8x128xf32>
    tpu.vector_store %arg4[%c0_5, %c0_6], %6 {strides = array<i32>} : memref<8x128xf32, #tpu.memory_space<vmem>>, vector<8x128xf32>,
    return
  }
  func.func @transform_0(%arg0: i32) -> (i32, i32) {
    %c0_i32 = arith.constant 0 : i32
    %c0_i32_0 = arith.constant 0 : i32
    return %arg0, %c0_i32 : i32, i32
  }
  func.func @transform_1(%arg0: i32) -> (i32, i32) {
    %c0_i32 = arith.constant 0 : i32
    %c0_i32_0 = arith.constant 0 : i32
    %c0_i32_1 = arith.constant 0 : i32
    return %c0_i32, %c0_i32_0 : i32, i32
  }
  func.func @transform_2(%arg0: i32) -> (i32, i32) {
    %c0_i32 = arith.constant 0 : i32
    %c0_i32_0 = arith.constant 0 : i32
    %c0_i32_1 = arith.constant 0 : i32
    return %c0_i32, %c0_i32_0 : i32, i32
  }
  func.func @transform_3(%arg0: i32) -> (i32, i32) {
    %c0_i32 = arith.constant 0 : i32
    %c0_i32_0 = arith.constant 0 : i32
    return %arg0, %c0_i32 : i32, i32
  }
}

</mosaic_0001>

<bundles_post_ra>
// kernel: tpu_custom_call.1
= control target key start
LH: loop header
LB: loop body
LE: loop exit
PB: predicated region body
PF: predicated region fallthrough
CT: control target
= control target key end

     0   :  { %10 = vsyncpa [#allocation5], 0  ;;  %s144_s0 = inlined_call_operand.hbm [shape: f32[8,128], index: 0, kind: input, shape index: {}]   ;;  %s145_s1 = inlined_call_operand.<no memory space> [shape: f32[1,1], index: 1, kind: input, shape index: {}]   ;;  %s146_s2 = inlined_call_operand.<no memory space> [shape: f32[1,1], index: 2, kind: input, shape index: {}]   ;;  %s147_s3 = inlined_call_operand.hbm [shape: f32[8,128], index: 3, kind: output, shape index: {}]  }
   0x1   :  { %11 = vsyncpa [#allocation6], 0  ;;  %s17_s14 = sshll.u32 %s144_s0, 4  ;;  %s110_s15 = smov [#allocation4]   ;;  %s18_s14 = int_to_ptr.hbm [resolvable:$true] %s17_s14 }
   0x2   :  { %s19_s16 = sshll.u32 %s110_s15, 4  ;;  %s20_s16 = int_to_ptr.vmem [resolvable:$true] %s19_s16 }
   0x3   :  { %22 = dma.hbm_to_vmem [thread:$0]  %s18_s14, 128, %s20_s16, [#allocation5]  }
   0x4   :  { %106 = dma.done.wait [#allocation5], 128  }
   0x5   :  { %107 = vsyncadd [#allocation5], 4294967168  ;;  %v34_v0 = vstv %s145_s1  ;;  %v33_v1 = vld [vmem:[#allocation4] sm:$0xff]  ;;  %v36_v2 = vstv %s146_s2  ;;  %s111_s21 = smov [#allocation7]   ;;  %s46_s24 = sshll.u32 %s147_s3, 4  ;;  %s47_s24 = int_to_ptr.hbm [resolvable:$true] %s46_s24 }
   0x6   :  { %s44_s22 = sshll.u32 %s111_s21, 4  ;;  %v35_v3 = vmul.f32 %v34_v0, %v33_v1  ;;  %s45_s22 = int_to_ptr.vmem [resolvable:$true] %s44_s22 }
   0x8   :  { %v37_v4 = vadd.f32 %v36_v2, %v35_v3 }
   0xa   :  { %38 = vst [vmem:[#allocation7] sm:$0xff] %v37_v4 }
   0xb   :  { %49 = dma.vmem_to_hbm [thread:$0]  %s45_s22, 128, %s47_s24, [#allocation6]  }
   0xc   :  { %108 = dma.done.wait [#allocation6], 128  }
   0xd   :  { %109 = vsyncadd [#allocation6], 4294967168 }
   0xe   :  { %54 = vsyncpa [#allocation5], 1 }
   0xf   :  { %55 = vsyncpa [#allocation6], 1 }

</bundles_post_ra>
